<compile_context>
chip_gen: v7x
topology: tpu7x:2x2x1
jax: 0.10.0
libtpu: 0.0.40
codegen_flags: <defaults>
</compile_context>

<pallas_src>
import functools

import jax
import jax.numpy as jnp
from jax.experimental import pallas as pl
from jax.experimental.pallas import tpu as pltpu


# --------------------------------------------------------------------------- #
# helpers
# --------------------------------------------------------------------------- #
def _layer_norm(x, gamma, beta, eps):
    mu = jnp.mean(x, axis=-1, keepdims=True)
    var = jnp.mean((x - mu) ** 2, axis=-1, keepdims=True)
    return (x - mu) * jax.lax.rsqrt(var + eps) * gamma + beta


def _const_spec(shape):
    """BlockSpec for a block whose index map is constant over the grid.

    Single-buffered (pl.Buffered(1)): it is DMA'd once and stays resident, so
    double buffering would only waste VMEM.  Falls back to the default spec if
    this JAX version does not accept pipeline_mode.
    """
    index_map = lambda *_: (0,) * len(shape)
    try:
        return pl.BlockSpec(shape, index_map, pipeline_mode=pl.Buffered(1))
    except Exception:  # pragma: no cover - older Pallas without pipeline_mode
        return pl.BlockSpec(shape, index_map)


def _pick_tile(total, max_tile):
    for cand in (512, 256, 128, 64, 32, 16, 8):
        if cand <= max_tile and total % cand == 0:
            return cand
    return total


def _max_q_tile():
    # v6e keeps the larger query tile; v5e (128-wide MXU) and v7x (64 MiB VMEM)
    # prefer 128 per the performance review.
    try:
        kind = jax.devices()[0].device_kind.lower()
    except Exception:
        kind = ""
    return 256 if "v6" in kind else 128


def _vmem_limit_bytes():
    # Generation-aware scoped-VMEM limit (default scoped limits of 16/32 MiB
    # are far below what production shapes need).
    try:
        cap = int(pltpu.get_tpu_info().vmem_capacity_bytes)
    except Exception:
        cap = 64 * 1024 * 1024
    return min(cap * 7 // 8, 112 * 1024 * 1024)


# --------------------------------------------------------------------------- #
# kernel 1: K / V projection, head-split once
# --------------------------------------------------------------------------- #
def _kv_proj_kernel(src_ref, wk_ref, bk_ref, wv_ref, bv_ref, k_ref, v_ref,
                    *, nhead):
    ts, d = src_ref.shape[1], src_ref.shape[2]
    hd = d // nhead
    x = src_ref[0].astype(jnp.bfloat16)                                # (TS, D)
    k = jnp.dot(x, wk_ref[...], preferred_element_type=jnp.float32) + bk_ref[...]
    v = jnp.dot(x, wv_ref[...], preferred_element_type=jnp.float32) + bv_ref[...]
    # (TS, D) -> (H, TS, hd): the lane-splitting relayout is paid once here,
    # not on every (query tile, KV chunk) step of the attention kernel.
    k_ref[0] = jnp.transpose(k.reshape(ts, nhead, hd), (1, 0, 2)).astype(jnp.bfloat16)
    v_ref[0] = jnp.transpose(v.reshape(ts, nhead, hd), (1, 0, 2)).astype(jnp.bfloat16)


# --------------------------------------------------------------------------- #
# kernel 2: flash attention + out-proj + LN1 + FF + LN2 (fused per query tile)
# --------------------------------------------------------------------------- #
def _encoder_kernel(src_ref, k_ref, v_ref,
                    wq_ref, bq_ref, wo_ref, bo_ref,
                    g1_ref, beta1_ref,
                    w1_ref, b1_ref, w2_ref, b2_ref,
                    g2_ref, beta2_ref,
                    out_ref,
                    qh_scr, m_scr, l_scr, acc_scr,
                    *, eps):
    kv = pl.program_id(2)
    nhead, tq, hd = qh_scr.shape
    scale = float(hd) ** -0.5

    # ---- init per query tile: Q projection + online-softmax state ----
    @pl.when(kv == 0)
    def _():
        xb = src_ref[0].astype(jnp.bfloat16)                           # (TQ, D)
        q = jnp.dot(xb, wq_ref[...], preferred_element_type=jnp.float32) + bq_ref[...]
        qh_scr[...] = jnp.transpose(q.reshape(tq, nhead, hd), (1, 0, 2)).astype(jnp.bfloat16)
        m_scr[...] = jnp.full(m_scr.shape, -jnp.inf, dtype=m_scr.dtype)
        l_scr[...] = jnp.zeros(l_scr.shape, dtype=l_scr.dtype)
        acc_scr[...] = jnp.zeros(acc_scr.shape, dtype=acc_scr.dtype)

    # ---- flash-style online softmax over this KV chunk ----
    s = jnp.einsum('hqd,hkd->hqk', qh_scr[...], k_ref[0],
                   preferred_element_type=jnp.float32) * scale          # (H, TQ, TK)
    # TODO(synk): attn_mask / key_padding_mask not supported (none at call site).
    m_new = jnp.maximum(m_scr[...], jnp.max(s, axis=-1, keepdims=True))
    alpha = jnp.exp(m_scr[...] - m_new)
    p = jnp.exp(s - m_new)
    l_scr[...] = alpha * l_scr[...] + jnp.sum(p, axis=-1, keepdims=True)
    acc_scr[...] = alpha * acc_scr[...] + jnp.einsum(
        'hqk,hkd->hqd', p.astype(jnp.bfloat16), v_ref[0],
        preferred_element_type=jnp.float32)                             # (H, TQ, hd)
    m_scr[...] = m_new

    # ---- finalize: out-proj, residual+LN1, FF, residual+LN2 ----
    @pl.when(kv == pl.num_programs(2) - 1)
    def _():
        o = acc_scr[...] * pl.reciprocal(l_scr[...], approx=True)       # (H, TQ, hd)
        attn = jnp.transpose(o, (1, 0, 2)).reshape(tq, nhead * hd)      # (TQ, D)
        attn = jnp.dot(attn.astype(jnp.bfloat16), wo_ref[...],
                       preferred_element_type=jnp.float32) + bo_ref[...]

        x = src_ref[0].astype(jnp.float32)                              # residual in f32
        y = _layer_norm(x + attn, g1_ref[...], beta1_ref[...], eps)

        h = jnp.dot(y.astype(jnp.bfloat16), w1_ref[...],
                    preferred_element_type=jnp.float32) + b1_ref[...]
        h = jnp.maximum(h, 0.0)
        ff = jnp.dot(h.astype(jnp.bfloat16), w2_ref[...],
                     preferred_element_type=jnp.float32) + b2_ref[...]

        z = _layer_norm(y + ff, g2_ref[...], beta2_ref[...], eps)
        out_ref[0] = z.astype(out_ref.dtype)


# --------------------------------------------------------------------------- #
# wrapper
# --------------------------------------------------------------------------- #
def transformer_encoder_ff_layer(src, params, *, nhead, eps=1e-5):
    B, T, D = src.shape
    F = params["w1"].shape[1]
    assert D % nhead == 0
    hd = D // nhead

    bf16 = jnp.bfloat16
    wq = params["wq"].astype(bf16)
    wk = params["wk"].astype(bf16)
    wv = params["wv"].astype(bf16)
    wo = params["wo"].astype(bf16)
    w1 = params["w1"].astype(bf16)
    w2 = params["w2"].astype(bf16)

    tq = _pick_tile(T, _max_q_tile())   # query tile (generation-aware cap)
    tk = _pick_tile(T, 512)             # KV chunk of the flash loop
    ts = _pick_tile(T, 256)             # row tile of the KV-projection kernel
    vmem_limit = _vmem_limit_bytes()

    # ---------------- kernel 1: K/V projection -> (B, H, T, hd) bf16 --------
    k_all, v_all = pl.pallas_call(
        functools.partial(_kv_proj_kernel, nhead=nhead),
        out_shape=(jax.ShapeDtypeStruct((B, nhead, T, hd), bf16),
                   jax.ShapeDtypeStruct((B, nhead, T, hd), bf16)),
        grid_spec=pltpu.PrefetchScalarGridSpec(
            num_scalar_prefetch=0,
            grid=(B, T // ts),
            in_specs=[
                pl.BlockSpec((1, ts, D), lambda b, t: (b, t, 0)),
                _const_spec((D, D)), _const_spec((1, D)),    # Wk, bk
                _const_spec((D, D)), _const_spec((1, D)),    # Wv, bv
            ],
            out_specs=(pl.BlockSpec((1, nhead, ts, hd), lambda b, t: (b, 0, t, 0)),
                       pl.BlockSpec((1, nhead, ts, hd), lambda b, t: (b, 0, t, 0))),
        ),
        compiler_params=pltpu.CompilerParams(
            dimension_semantics=("parallel", "parallel"),
            vmem_limit_bytes=vmem_limit),
    )(src, wk, params["bk"], wv, params["bv"])

    # ---------------- kernel 2: fused attention + FF encoder ----------------
    in_specs = [
        pl.BlockSpec((1, tq, D), lambda b, q, k: (b, q, 0)),             # Q / residual tile
        pl.BlockSpec((1, nhead, tk, hd), lambda b, q, k: (b, 0, k, 0)),  # K chunk
        pl.BlockSpec((1, nhead, tk, hd), lambda b, q, k: (b, 0, k, 0)),  # V chunk
        _const_spec((D, D)), _const_spec((1, D)),                        # Wq, bq
        _const_spec((D, D)), _const_spec((1, D)),                        # Wo, bo
        _const_spec((1, D)), _const_spec((1, D)),                        # LN1 gamma, beta
        _const_spec((D, F)), _const_spec((1, F)),                        # FF W1, b1
        _const_spec((F, D)), _const_spec((1, D)),                        # FF W2, b2
        _const_spec((1, D)), _const_spec((1, D)),                        # LN2 gamma, beta
    ]

    itemsize = jnp.dtype(src.dtype).itemsize
    cost = pl.CostEstimate(
        flops=int(B * T * (8 * D * D + 4 * T * D + 4 * D * F)),
        transcendentals=int(B * nhead * T * T),
        bytes_accessed=int(
            2 * B * T * D * itemsize          # src in + out
            + 2 * 2 * B * T * D               # bf16 K and V streamed in
            + 2 * (4 * D * D + 2 * D * F)     # bf16 weights
            + 4 * (6 * D + F)),               # f32 biases / LN params
    )

    out = pl.pallas_call(
        functools.partial(_encoder_kernel, eps=eps),
        out_shape=jax.ShapeDtypeStruct((B, T, D), src.dtype),
        grid_spec=pltpu.PrefetchScalarGridSpec(
            num_scalar_prefetch=0,
            grid=(B, T // tq, T // tk),
            in_specs=in_specs,
            out_specs=pl.BlockSpec((1, tq, D), lambda b, q, k: (b, q, 0)),
            scratch_shapes=[
                pltpu.VMEM((nhead, tq, hd), bf16),          # Q (head-split), set at kv==0
                pltpu.VMEM((nhead, tq, 1), jnp.float32),    # running max
                pltpu.VMEM((nhead, tq, 1), jnp.float32),    # running denominator
                pltpu.VMEM((nhead, tq, hd), jnp.float32),   # attention accumulator
            ],
        ),
        compiler_params=pltpu.CompilerParams(
            dimension_semantics=("parallel", "parallel", "arbitrary"),
            vmem_limit_bytes=vmem_limit),
        cost_estimate=cost,
    )(src, k_all, v_all,
      wq, params["bq"], wo, params["bo"],
      params["g1"], params["beta1"],
      w1, params["b1"], w2, params["b2"],
      params["g2"], params["beta2"])
    return out


# --------------------------------------------------------------------------- #
# pure-JAX reference (matches the PyTorch module in eval mode)
# --------------------------------------------------------------------------- #
def _reference(src, p, nhead, eps=1e-5):
    B, T, D = src.shape
    hd = D // nhead
    scale = hd ** -0.5

    def ln(x, g, b):
        mu = jnp.mean(x, axis=-1, keepdims=True)
        var = jnp.mean((x - mu) ** 2, axis=-1, keepdims=True)
        return (x - mu) / jnp.sqrt(var + eps) * g + b

    q = src @ p["wq"] + p["bq"]
    k = src @ p["wk"] + p["bk"]
    v = src @ p["wv"] + p["bv"]
    q = q.reshape(B, T, nhead, hd).transpose(0, 2, 1, 3)
    k = k.reshape(B, T, nhead, hd).transpose(0, 2, 1, 3)
    v = v.reshape(B, T, nhead, hd).transpose(0, 2, 1, 3)
    s = jnp.einsum("bhqd,bhkd->bhqk", q, k) * scale
    pattn = jax.nn.softmax(s, axis=-1)
    o = jnp.einsum("bhqk,bhkd->bhqd", pattn, v)
    o = o.transpose(0, 2, 1, 3).reshape(B, T, D)
    attn = o @ p["wo"] + p["bo"]
    y = ln(src + attn, p["g1"], p["beta1"])
    ff = jnp.maximum(y @ p["w1"] + p["b1"], 0.0) @ p["w2"] + p["b2"]
    return ln(y + ff, p["g2"], p["beta2"])


if __name__ == "__main__":
    B, T, D, H, FF = 2, 8, 32, 4, 64

    key = jax.random.PRNGKey(0)
    ks = jax.random.split(key, 12)

    def w(k, shape, scale=0.05):
        return (scale * jax.random.normal(k, shape)).astype(jnp.float32)

    params = {
        "wq": w(ks[0], (D, D)), "bq": w(ks[1], (1, D)),
        "wk": w(ks[2], (D, D)), "bk": w(ks[3], (1, D)),
        "wv": w(ks[4], (D, D)), "bv": w(ks[5], (1, D)),
        "wo": w(ks[6], (D, D)), "bo": w(ks[7], (1, D)),
        "g1": jnp.ones((1, D), jnp.float32), "beta1": jnp.zeros((1, D), jnp.float32),
        "w1": w(ks[8], (D, FF)), "b1": w(ks[9], (1, FF)),
        "w2": w(ks[10], (FF, D)), "b2": w(ks[11], (1, D)),
        "g2": jnp.ones((1, D), jnp.float32), "beta2": jnp.zeros((1, D), jnp.float32),
    }

    src = jax.random.normal(jax.random.PRNGKey(42), (B, T, D), jnp.float32)

    out = transformer_encoder_ff_layer(src, params, nhead=H)
    out = jax.block_until_ready(out)

    ref = _reference(src, params, H)
    assert out.shape == (B, T, D)
    # bf16 MXU operands + approx reciprocal in the softmax denominator ->
    # looser tolerance than a pure-f32 implementation.
    assert jnp.allclose(out, ref, atol=2e-2, rtol=2e-2), "mismatch vs reference"

    print("KERNEL_OK")
</pallas_src>

<mosaic_0001>
module attributes {stable_mosaic.version = 11 : i64} {
  func.func @_kv_proj_kernel(%arg0: i32, %arg1: i32, %arg2: memref<1x8x32xf32, #tpu.memory_space<vmem>>, %arg3: memref<32x32xbf16, #tpu.memory_space<vmem>>, %arg4: memref<1x32xf32, #tpu.memory_space<vmem>>, %arg5: memref<32x32xbf16, #tpu.memory_space<vmem>>, %arg6: memref<1x32xf32, #tpu.memory_space<vmem>>, %arg7: memref<1x4x8x8xbf16, #tpu.memory_space<vmem>>, %arg8: memref<1x4x8x8xbf16, #tpu.memory_space<vmem>>) attributes {dimension_semantics = [#tpu.dimension_semantics<parallel>, #tpu.dimension_semantics<parallel>], iteration_bounds = array<i64: 2, 1>, scalar_prefetch = 0 : i64, scratch_operands = 0 : i64, tpu.core_type = #tpu.core_type<tc>, window_params = [{transform_indices = @transform_0, window_bounds = array<i64: 1, 8, 32>}, {pipeline_mode = #tpu.pipeline_mode<synchronous>, transform_indices = @transform_1, window_bounds = array<i64: 32, 32>}, {pipeline_mode = #tpu.pipeline_mode<synchronous>, transform_indices = @transform_2, window_bounds = array<i64: 1, 32>}, {pipeline_mode = #tpu.pipeline_mode<synchronous>, transform_indices = @transform_3, window_bounds = array<i64: 32, 32>}, {pipeline_mode = #tpu.pipeline_mode<synchronous>, transform_indices = @transform_4, window_bounds = array<i64: 1, 32>}, {transform_indices = @transform_5, window_bounds = array<i64: 1, 4, 8, 8>}, {transform_indices = @transform_6, window_bounds = array<i64: 1, 4, 8, 8>}]} {
    %c0 = arith.constant 0 : index
    %c0_0 = arith.constant 0 : index
    %c0_1 = arith.constant 0 : index
    %0 = vector.load %arg2[%c0, %c0_0, %c0_1] : memref<1x8x32xf32, #tpu.memory_space<vmem>>, vector<1x8x32xf32>
    %1 = vector.shape_cast %0 : vector<1x8x32xf32> to vector<8x32xf32>
    %2 = arith.truncf %1 : vector<8x32xf32> to vector<8x32xbf16>
    %c0_2 = arith.constant 0 : index
    %c0_3 = arith.constant 0 : index
    %3 = vector.load %arg3[%c0_2, %c0_3] : memref<32x32xbf16, #tpu.memory_space<vmem>>, vector<32x32xbf16>
    %cst = arith.constant dense<0.000000e+00> : vector<8x32xf32>
    %4 = tpu.matmul %2, %3, %cst {dimension_numbers = #tpu.dot_dimension_numbers<[1], [0], [0], [1], [0, 0, 1, 1], [], []>} : vector<8x32xbf16>, vector<32x32xbf16>, vector<8x32xf32> -> vector<8x32xf32>
    %c0_4 = arith.constant 0 : index
    %c0_5 = arith.constant 0 : index
    %5 = vector.load %arg4[%c0_4, %c0_5] : memref<1x32xf32, #tpu.memory_space<vmem>>, vector<1x32xf32>
    %6 = vector.broadcast %5 : vector<1x32xf32> to vector<8x32xf32>
    %7 = arith.addf %4, %6 : vector<8x32xf32>
    %c0_6 = arith.constant 0 : index
    %c0_7 = arith.constant 0 : index
    %8 = vector.load %arg5[%c0_6, %c0_7] : memref<32x32xbf16, #tpu.memory_space<vmem>>, vector<32x32xbf16>
    %cst_8 = arith.constant dense<0.000000e+00> : vector<8x32xf32>
    %9 = tpu.matmul %2, %8, %cst_8 {dimension_numbers = #tpu.dot_dimension_numbers<[1], [0], [0], [1], [0, 0, 1, 1], [], []>} : vector<8x32xbf16>, vector<32x32xbf16>, vector<8x32xf32> -> vector<8x32xf32>
    %c0_9 = arith.constant 0 : index
    %c0_10 = arith.constant 0 : index
    %10 = vector.load %arg6[%c0_9, %c0_10] : memref<1x32xf32, #tpu.memory_space<vmem>>, vector<1x32xf32>
    %11 = vector.broadcast %10 : vector<1x32xf32> to vector<8x32xf32>
    %12 = arith.addf %9, %11 : vector<8x32xf32>
    %13 = vector.shape_cast %7 : vector<8x32xf32> to vector<8x4x8xf32>
    %14 = tpu.transpose %13, [1, 0, 2] : vector<8x4x8xf32> -> vector<4x8x8xf32>
    %15 = arith.truncf %14 : vector<4x8x8xf32> to vector<4x8x8xbf16>
    %c0_11 = arith.constant 0 : index
    %c0_12 = arith.constant 0 : index
    %c0_13 = arith.constant 0 : index
    %c0_14 = arith.constant 0 : index
    %16 = vector.load %arg7[%c0_11, %c0_12, %c0_13, %c0_14] : memref<1x4x8x8xbf16, #tpu.memory_space<vmem>>, vector<1x4x8x8xbf16>
    %17 = vector.shape_cast %16 : vector<1x4x8x8xbf16> to vector<4x8x8xbf16>
    %18 = vector.shape_cast %15 : vector<4x8x8xbf16> to vector<1x4x8x8xbf16>
    tpu.vector_store %arg7[%c0_11, %c0_12, %c0_13, %c0_14], %18 {strides = array<i32>} : memref<1x4x8x8xbf16, #tpu.memory_space<vmem>>, vector<1x4x8x8xbf16>,
    %19 = vector.shape_cast %12 : vector<8x32xf32> to vector<8x4x8xf32>
    %20 = tpu.transpose %19, [1, 0, 2] : vector<8x4x8xf32> -> vector<4x8x8xf32>
    %21 = arith.truncf %20 : vector<4x8x8xf32> to vector<4x8x8xbf16>
    %c0_15 = arith.constant 0 : index
    %c0_16 = arith.constant 0 : index
    %c0_17 = arith.constant 0 : index
    %c0_18 = arith.constant 0 : index
    %22 = vector.load %arg8[%c0_15, %c0_16, %c0_17, %c0_18] : memref<1x4x8x8xbf16, #tpu.memory_space<vmem>>, vector<1x4x8x8xbf16>
    %23 = vector.shape_cast %22 : vector<1x4x8x8xbf16> to vector<4x8x8xbf16>
    %24 = vector.shape_cast %21 : vector<4x8x8xbf16> to vector<1x4x8x8xbf16>
    tpu.vector_store %arg8[%c0_15, %c0_16, %c0_17, %c0_18], %24 {strides = array<i32>} : memref<1x4x8x8xbf16, #tpu.memory_space<vmem>>, vector<1x4x8x8xbf16>,
    return
  }
  func.func @transform_0(%arg0: i32, %arg1: i32) -> (i32, i32, i32) {
    %c0_i32 = arith.constant 0 : i32
    %c0_i32_0 = arith.constant 0 : i32
    return %arg0, %arg1, %c0_i32 : i32, i32, i32
  }
  func.func @transform_1(%arg0: i32, %arg1: i32) -> (i32, i32) {
    %c0_i32 = arith.constant 0 : i32
    %c0_i32_0 = arith.constant 0 : i32
    %c0_i32_1 = arith.constant 0 : i32
    return %c0_i32, %c0_i32_0 : i32, i32
  }
  func.func @transform_2(%arg0: i32, %arg1: i32) -> (i32, i32) {
    %c0_i32 = arith.constant 0 : i32
    %c0_i32_0 = arith.constant 0 : i32
    %c0_i32_1 = arith.constant 0 : i32
    return %c0_i32, %c0_i32_0 : i32, i32
  }
  func.func @transform_3(%arg0: i32, %arg1: i32) -> (i32, i32) {
    %c0_i32 = arith.constant 0 : i32
    %c0_i32_0 = arith.constant 0 : i32
    %c0_i32_1 = arith.constant 0 : i32
    return %c0_i32, %c0_i32_0 : i32, i32
  }
  func.func @transform_4(%arg0: i32, %arg1: i32) -> (i32, i32) {
    %c0_i32 = arith.constant 0 : i32
    %c0_i32_0 = arith.constant 0 : i32
    %c0_i32_1 = arith.constant 0 : i32
    return %c0_i32, %c0_i32_0 : i32, i32
  }
  func.func @transform_5(%arg0: i32, %arg1: i32) -> (i32, i32, i32, i32) {
    %c0_i32 = arith.constant 0 : i32
    %c0_i32_0 = arith.constant 0 : i32
    %c0_i32_1 = arith.constant 0 : i32
    return %arg0, %c0_i32, %arg1, %c0_i32_0 : i32, i32, i32, i32
  }
  func.func @transform_6(%arg0: i32, %arg1: i32) -> (i32, i32, i32, i32) {
    %c0_i32 = arith.constant 0 : i32
    %c0_i32_0 = arith.constant 0 : i32
    %c0_i32_1 = arith.constant 0 : i32
    return %arg0, %c0_i32, %arg1, %c0_i32_0 : i32, i32, i32, i32
  }
}

</mosaic_0001>

<bundles_post_ra>
// kernel: tpu_custom_call.1
= control target key start
LH: loop header
LB: loop body
LE: loop exit
PB: predicated region body
PF: predicated region fallthrough
CT: control target
= control target key end

     0   :  { %12 = vsyncpa [#allocation3], 0  ;;  %s1717_s0 = inlined_call_operand.hbm [shape: f32[2,8,32], index: 0, kind: input, shape index: {}]   ;;  %s1718_s1 = inlined_call_operand.hbm [shape: bf16[32,32], index: 1, kind: input, shape index: {}]   ;;  %s1719_s2 = inlined_call_operand.vmem [shape: f32[1,32], index: 2, kind: input, shape index: {}]   ;;  %s1720_s3 = inlined_call_operand.hbm [shape: bf16[32,32], index: 3, kind: input, shape index: {}]   ;;  %s1721_s4 = inlined_call_operand.vmem [shape: f32[1,32], index: 4, kind: input, shape index: {}]   ;;  %s1722_s5 = inlined_call_operand.hbm [shape: bf16[2,4,8,8], index: 5, kind: output, shape index: {0}]   ;;  %s1723_s6 = inlined_call_operand.hbm [shape: bf16[2,4,8,8], index: 6, kind: output, shape index: {1}]  }
   0x1   :  { %14 = vsyncpa [#allocation3 + $0x1], 0 }
   0x2   :  { %15 = vsyncpa [#allocation6], 0 }
   0x3   :  { %16 = vsyncpa [#allocation4], 0 }
   0x4   :  { %18 = vsyncpa [#allocation4 + $0x1], 0 }
   0x5   :  { %19 = vsyncpa [#allocation10], 0 }
   0x6   :  { %21 = vsyncpa [#allocation10 + $0x1], 0  ;;  %s1360_s21 = smov 0   ;;  %s1362_s22 = smov 0  }
   0x7   :  { %s1364_s23 = smov 0   ;;  %s1366_s24 = smov 0  }
   0x8   :  { %s1368_s25 = smov 0   ;;  %s1370_s26 = smov 0  }
   0x9 LB: > { %s942_s27 = sadd.s32 4294967295, %s1307_s26   ;;  %s943_s28 = sadd.s32 4294967294, %s1307_s26   ;;  %s1307_s26 = sphi %s1370_s26, %s27_s26   ;;  %s1303_s25 = sphi %s1368_s25, %s1748_s25   ;;  %s1299_s24 = sphi %s1366_s24, %s1747_s24   ;;  %s1295_s23 = sphi %s1364_s23, %s1746_s23   ;;  %s1291_s22 = sphi %s1362_s22, %s1745_s22   ;;  %s1287_s21 = sphi %s1360_s21, %s1744_s21  }
   0xa   : > { %p61_p0 = scmp.ne.s32.totalorder %s1291_s22, %s1287_s21  ;;  %p1394_p1 = scmp.eq.s32.totalorder %s942_s27, 0 }
   0xb   : > { %p1398_p2 = scmp.eq.s32.totalorder %s942_s27, 1  ;;  %p177_p3 = scmp.eq.s32.totalorder %s943_s28, 1 }
   0xc   : > { %s1729_s29 = scalar_select %p1394_p1, 1, 0 }
   0xd   : > { %p1404_p4 = por %p1394_p1, %p61_p0  ;;  %p944_p5 = scmp.ge.s32.totalorder %s1307_s26, 1 }
   0xe   : > { %p1409_p6 = por %p177_p3, %p61_p0  ;;  %p212_p7 = scmp.lt.s32.totalorder %s1307_s26, 3 }
   0xf   : > { %s1731_s7 = scalar_select %p1404_p4, 1, 0 }
  0x10   : > { %s1732_s8 = scalar_select %p1409_p6, 1, 0 }
  0x11   : > { %p1414_p8 = pnand %p944_p5, %p212_p7  ;;  %s1309_s10 = smov [#allocation5]  }
  0x12   : > { %1733 = sst [smem:[#allocation15_spill]] %s1732_s8  ;;  %s224_s11 = sshll.u32 %s1309_s10, 4  ;;  %s1418_s11 = int_to_ptr.vmem [resolvable:$true] %s224_s11 }
  0x13   : > { %p1014_p9 = pneg %p1414_p8  ;;  %s1310_s13 = smov [#allocation7]  }
  0x14   : > { %s240_s14 = sshll.u32 %s1310_s13, 4  ;;  %s1103_s17 = scalar_lea.hbm %s1718_s1, 256  ;;  %s1429_s14 = int_to_ptr.vmem [resolvable:$true] %s240_s14 }
  0x15   : > { %p1425_p11 = pnand %p1014_p9, %p1394_p1  ;;  %p1104_p12 = scmp.ne.s32.totalorder %s1718_s1, %s1103_s17 }
  0x16   : > { %p1110_p5 = scmp.lt.u32.totalorder %s1103_s17, %s1718_s1 }
  0x17   : > { %p1105_p13 = pneg %p1425_p11 }
  0x19   : > { %p1106_p0 = pnand %p1105_p13, %p1104_p12 }
  0x1b   : > { %p1107_p3 = pneg %p1106_p0 }
  0x1d   : > { %p1112_p7 = pnand %p1110_p5, %p1107_p3 }
  0x1f   : > { %1115 = shalt.err (!%p1112_p7)
}
  0x20   : > { %s1116_s28 = scalar_lea.vmem %s1418_s11, 256  ;;  %p1124_p1 = scmp.lt.s32.totalorder %s1418_s11, %s1418_s11 }
  0x21   : > { %p1117_p9 = scmp.ne.s32.totalorder %s1418_s11, %s1116_s28  ;;  %p1125_p12 = scmp.lt.s32.totalorder %s1116_s28, %s1116_s28 }
  0x23   : > { %p1119_p10 = pnand %p1117_p9, %p1105_p13  ;;  %p1126_p0 = por %p1125_p12, %p1124_p1 }
  0x25   : > { %p1120_p6 = pneg %p1119_p10 }
  0x27   : > { %p1127_p4 = pnand %p1126_p0, %p1120_p6 }
  0x29   : > { %1130 = shalt.err (!%p1127_p4)
}
  0x2a   : > { %s1311_s10 = smov 64   ;;  %s1312_s13 = smov 4  }
  0x2b   : > { %1017 = dma.hbm_to_vmem [thread:$0]  (!%p1425_p11), %s1718_s1, 256, %s1418_s11, [#allocation6], %s1311_s10, %s1311_s10, %s1312_s13  }
  0x2c   : > { %s1131_s19 = scalar_lea.hbm %s1720_s3, 256 }
  0x2d   : > { %p1132_p1 = scmp.ne.s32.totalorder %s1720_s3, %s1131_s19  ;;  %p1138_p10 = scmp.lt.u32.totalorder %s1131_s19, %s1720_s3 }
  0x2f   : > { %p1134_p4 = pnand %p1132_p1, %p1105_p13 }
  0x31   : > { %p1135_p6 = pneg %p1134_p4 }
  0x33   : > { %p1140_p3 = pnand %p1138_p10, %p1135_p6 }
  0x35   : > { %1143 = shalt.err (!%p1140_p3)
}
  0x36   : > { %s1144_s11 = scalar_lea.vmem %s1429_s14, 256  ;;  %p1152_p12 = scmp.lt.s32.totalorder %s1429_s14, %s1429_s14 }
  0x37   : > { %p1145_p5 = scmp.ne.s32.totalorder %s1429_s14, %s1144_s11  ;;  %p1153_p0 = scmp.lt.s32.totalorder %s1144_s11, %s1144_s11 }
  0x39   : > { %p1147_p7 = pnand %p1145_p5, %p1105_p13  ;;  %p1154_p1 = por %p1153_p0, %p1152_p12 }
  0x3b   : > { %p1148_p9 = pneg %p1147_p7 }
  0x3d   : > { %p1155_p4 = pnand %p1154_p1, %p1148_p9 }
  0x3f   : > { %1158 = shalt.err (!%p1155_p4)
}
  0x40   : > { %1020 = dma.hbm_to_vmem [thread:$0]  (!%p1425_p11), %s1720_s3, 256, %s1429_s14, [#allocation6], %s1311_s10, %s1311_s10, %s1312_s13  }
  0x41   : > { %s39_s16 = sadd.s32 1, %s1303_s25  ;;  %s48_s17 = sadd.s32 1, %s1295_s23 }
  0x42   : > { %p41_p13 = scmp.ge.s32.totalorder %s39_s16, 2  ;;  %p55_p6 = scmp.ne.s32.totalorder %s1295_s23, %s1291_s22 }
  0x43   : > { %p56_p10 = scmp.eq.s32.totalorder %s1307_s26, 0  ;;  %p1034_p3 = scmp.lt.s32.totalorder %s1307_s26, 2 }
  0x44   : > { %s1750_s16 = smov (%p41_p13, %s39_s16), 0  ;;  %p1493_p7 = por %p1398_p2, %p55_p6 }
  0x45   : > { %p57_p5 = por %p56_p10, %p55_p6  ;;  %s43_s18 = ssub.s32 %s1303_s25, %s1750_s16 }
  0x46   : > { %s1736_s12 = scalar_select %p1493_p7, 1, 0 }
  0x47   : > { %s257_s19 = sand.u32 1, %s1295_s23   ;;  %p46_p9 = scmp.eq.s32.totalorder %s43_s18, 0 }
  0x48   : > { %s948_s14 = sshll.u32 %s257_s19, 3  ;;  %s949_s10 = sshll.u32 %s1303_s25, 7 }
  0x49   : > { %s1502_s13 = scalar_select %p46_p9, %s1295_s23, %s48_s17  }
  0x4a   : > { %s1507_s28 = scalar_lea.hbm %s1717_s0, %s949_s10  ;;  %s261_s30 = scalar_lea.vmem [#allocation2], %s948_s14 }
  0x4b   : > { %s269_s11 = sshll.u32 %s261_s30, 4  ;;  %p1511_p2 = pnand %p1034_p3, %p57_p5  ;;  %s1515_s11 = int_to_ptr.vmem [resolvable:$true] %s269_s11 }
  0x4c   : > { %s258_s15 = scalar_lea.sflag [#allocation3], %s257_s19  ;;  %s1159_s17 = scalar_lea.hbm %s1507_s28, 128 }
  0x4d   : > { %p1160_p11 = scmp.ne.s32.totalorder %s1507_s28, %s1159_s17  ;;  %p1161_p12 = pneg %p1511_p2 }
  0x4e   : > { %s1164_s10 = scalar_lea.hbm %s1717_s0, 256  ;;  %p1165_p4 = scmp.lt.u32.totalorder %s1507_s28, %s1717_s0 }
  0x4f   : > { %p1162_p0 = pnand %p1161_p12, %p1160_p11  ;;  %p1166_p13 = scmp.lt.u32.totalorder %s1164_s10, %s1159_s17 }
  0x50   : > { %p1168_p10 = scmp.lt.u32.totalorder %s1159_s17, %s1507_s28 }
  0x51   : > { %p1163_p1 = pneg %p1162_p0  ;;  %p1167_p6 = por %p1166_p13, %p1165_p4 }
  0x53   : > { %p1169_p3 = por %p1168_p10, %p1167_p6 }
  0x55   : > { %p1170_p5 = pnand %p1169_p3, %p1163_p1 }
  0x57   : > { %1173 = shalt.err (!%p1170_p5)
}
  0x58   : > { %s1174_s19 = scalar_lea.vmem %s1515_s11, 128  ;;  %s1313_s30 = smov [#allocation2]  }
  0x59   : > { %p1175_p9 = scmp.ne.s32.totalorder %s1515_s11, %s1174_s19  ;;  %s1179_s18 = sshll.u32 %s1313_s30, 4  ;;  %s1180_s18 = int_to_ptr.vmem [resolvable:$false] %s1179_s18 }
  0x5a   : > { %s1181_s14 = scalar_lea.vmem %s1180_s18, 256  ;;  %p1182_p7 = scmp.lt.s32.totalorder %s1515_s11, %s1180_s18 }
  0x5b   : > { %p1177_p11 = pnand %p1175_p9, %p1161_p12  ;;  %p1183_p4 = scmp.lt.s32.totalorder %s1181_s14, %s1174_s19 }
  0x5d   : > { %p1178_p0 = pneg %p1177_p11  ;;  %p1184_p13 = por %p1183_p4, %p1182_p7 }
  0x5f   : > { %p1185_p6 = pnand %p1184_p13, %p1178_p0 }
  0x61   : > { %1188 = shalt.err (!%p1185_p6)
}
  0x62   : > { %1024 = dma.hbm_to_vmem [thread:$0]  (!%p1511_p2), %s1507_s28, 128, %s1515_s11, %s258_s15  }
  0x63   : > { %278 = sbr.rel (%p1414_p8) target bundleno = 513 (0x201), region = 40  ;;  %s1545_s17 = sand.u32 (!%p1414_p8), 1, %s1291_s22  }
  0x64   : > { %s951_s10 = sshll.u32 (!%p1414_p8), %s1545_s17, 3  ;;  %s281_s20 = scalar_lea.sflag (!%p1414_p8), [#allocation3], %s1545_s17 }
  0x65   : > { %s284_s27 = scalar_lea.vmem (!%p1414_p8), [#allocation2], %s951_s10  ;;  %p1738_p7 = scmp.ne.s32.totalorder (!%p1414_p8), %s1731_s7, 0 }
  0x6a   : > { %1270 = dma.done.wait (%p1738_p7), %s281_s20, 128  }
  0x6b   : > { %1272 = vsyncadd (%p1738_p7), %s281_s20, 4294967168  ;;  %p1739_p12 = scmp.ne.s32.totalorder %s1729_s29, 0 }
  0x6d   : > { %1274 = dma.done.wait (%p1739_p12), [#allocation6], 512  }
  0x6e   : > { %1276 = vsyncadd (%p1739_p12), [#allocation6], 4294966784  ;;  %v1314_v0 = vmov 0.0   ;;  %vm1315_vm0 = vmmov 0   ;;  %v1099_v1 = vld [vmem:[#allocation5] sm:$0xff]   ;;  %v1100_v2 = vld [vmem:[#allocation7] sm:$0xff]   ;;  %v474_v21 = vlaneseq }
  0x6f   : > { %984 = vmatprep.subr.bf16.mxu0 %v1314_v0  ;;  %992 = vmatprep.subr.bf16.mxu1 %v1314_v0  ;;  %v1101_v3 = vld [vmem:[#allocation5 + $0x8] sm:$0xff]   ;;  %v1102_v4 = vld [vmem:[#allocation7 + $0x8] sm:$0xff]   ;;  %vm352_vm1 = vcmask 261120   ;;  %v956_v7 = vld [vmem:[%s1719_s2] ss:$0 sm:$0xff]  ;;  %s1316_s11 = smov 104  }
  0x70   : > { %988 = vmatprep.mubr.msk.bf16.mxu0 %vm1315_vm0, %v1314_v0  ;;  %996 = vmatprep.mubr.msk.bf16.mxu1 %vm1315_vm0, %v1314_v0  ;;  %v327_v5 = vld [vmem:[%s284_s27] sm:$0xff]  ;;  %s1317_s8 = smov 120   ;;  %s1318_s15 = smov 112   ;;  %v1319_v19 = vmov 1983009808   ;;  %v475_v25 = vshrl.u32 %v474_v21, 7 }
  0x71   : > { %985 = vmatpush3.bf16.msra.mxu0 %v1099_v1  ;;  %993 = vmatpush3.bf16.msra.mxu1 %v1100_v2  ;;  %v328_v6 = vpack.c.bf16 %v327_v5, %v327_v5  ;;  %v960_v9 = vld [vmem:[%s1721_s4] ss:$0 sm:$0xff]  ;;  %v472_v20 = vunpack.c.l.s4 %v1319_v19  ;;  %v1320_v22 = vmov 1934713408   ;;  %vm609_vm2 = vcmask 60416   ;;  %s954_s19 = sshll.u32 %s1545_s17, 4 }
  0x72   : > { %986 = vmatprep.subr.bf16.mxu0 %v1314_v0  ;;  %994 = vmatprep.subr.bf16.mxu1 %v1314_v0  ;;  %v504_v23 = vunpack.c.l.s4 %v1320_v22  ;;  %s976_s30 = sshll.u32 %s1299_s24, 8  ;;  %s318_s18 = scalar_lea.vmem [#allocation8], %s954_s19 }
  0x73   : > { %v473_v24 = vunpack.c.0.s8 %v472_v20  ;;  %s788_s14 = sshll.u32 %s318_s18, 4  ;;  %s1604_s27 = scalar_lea.hbm %s1722_s5, %s976_s30  ;;  %s1606_s14 = int_to_ptr.vmem [resolvable:$true] %s788_s14 }
  0x74   : > { %v505_v28 = vunpack.c.0.s8 %v504_v23  ;;  %s1618_s29 = scalar_lea.vmem [#allocation9], %s954_s19  ;;  %s769_s9 = scalar_lea.sflag [#allocation4], %s1545_s17 }
  0x75   : > { %987 = vmatpush3.bf16.msra.mxu0 %v1101_v3  ;;  %995 = vmatpush3.bf16.msra.mxu1 %v1102_v4  ;;  %v1563_v29 = vsub.s32 %v473_v24, %v475_v25  ;;  %s805_s7 = sshll.u32 %s1618_s29, 4  ;;  %s1189_s28 = scalar_lea.vmem %s1606_s14, 256  ;;  %s1657_s7 = int_to_ptr.vmem [resolvable:$true] %s805_s7 }
  0x76   : > { %v1565_v36 = vsub.s32 %v505_v28, %v475_v25  ;;  %p1190_p8 = scmp.ne.s32.totalorder %s1606_s14, %s1189_s28  ;;  %p1740_p2 = scmp.ne.s32.totalorder %s1736_s12, 0 }
  0x78   : > { %989 = vmatmul.mubr.msk.bf16.vlgmr.msra.gmra.mrb[0].mxu0 %vm352_vm1, %v328_v6  ;;  %997 = vmatmul.mubr.msk.bf16.vlgmr.msra.gmra.mrb[0].mxu1 %vm352_vm1, %v328_v6  ;;  %p1191_p1 = pnand %p1190_p8, %p1740_p2 }
  0x7a   : > { %p1192_p10 = pneg %p1191_p1 }
 0x14b   : > { %v390_v8 = vpop.f32.mrb[0].mxu0  ;;  %v453_v12 = vpop.f32.mrb[0].mxu1 }
 0x14c   : > { %v391_v10 = vadd.f32 %v956_v7, %v390_v8  ;;  %v990_v11 = vpop.f32.mrb[1].mxu0  ;;  %v998_v14 = vpop.f32.mrb[1].mxu1  ;;  %v454_v15 = vadd.f32 %v960_v9, %v453_v12 }
 0x14d   : > { %v393_v13 = vpop.f32.mrb[2].mxu0  ;;  %v456_v16 = vpop.f32.mrb[2].mxu1 }
 0x14e   : > { %466 = vrot.lane.b32.xlu1 %v391_v10, %s1316_s11  ;;  %460 = vrot.lane.b32.xlu0 %v391_v10, %s1317_s8  ;;  %v991_v17 = vpop.f32.mrb[3].mxu0  ;;  %v999_v18 = vpop.f32.mrb[3].mxu1 }
 0x152   : > { %615 = vrot.lane.b32.xlu1 %v454_v15, %s1317_s8  ;;  %463 = vrot.lane.b32.xlu0 %v391_v10, %s1318_s15 }
 0x156   : > { %621 = vrot.lane.b32.xlu1 %v454_v15, %s1316_s11  ;;  %618 = vrot.lane.b32.xlu0 %v454_v15, %s1318_s15  ;;  %s1321_s11 = smov [#allocation8]  }
 0x157   : > { %s1193_s8 = sshll.u32 %s1321_s11, 4  ;;  %s1194_s8 = int_to_ptr.vmem [resolvable:$false] %s1193_s8 }
 0x158   : > { %s1195_s15 = scalar_lea.vmem %s1194_s8, 512  ;;  %p1196_p3 = scmp.lt.s32.totalorder %s1606_s14, %s1194_s8 }
 0x159   : > { %p1197_p5 = scmp.lt.s32.totalorder %s1195_s15, %s1189_s28 }
 0x15b   : > { %p1198_p9 = por %p1197_p5, %p1196_p3 }
 0x15d   : > { %p1199_p11 = pnand %p1198_p9, %p1192_p10 }
 0x1c0   : > { %v467_v26 = vpop.permute.xlu1 %466  ;;  %v461_v27 = vpop.permute.xlu0 %460 }
 0x1c1   : > { %v485_v30 = vcombine.low %v461_v27, %v467_v26  ;;  %v486_v31 = vcombine.high %v461_v27, %v467_v26 }
 0x1c3   : > { %v493_v37 = vrot.slane %v485_v30, %v1563_v29  ;;  %v500_v38 = vrot.slane %v486_v31, %v1563_v29 }
 0x1c4   : > { %v616_v32 = vpop.permute.xlu1 %615  ;;  %v464_v33 = vpop.permute.xlu0 %463 }
 0x1c5   : > { %v469_v34 = vcombine.low %v391_v10, %v464_v33  ;;  %v470_v35 = vcombine.high %v391_v10, %v464_v33 }
 0x1c7   : > { %v477_v39 = vrot.slane %v469_v34, %v1563_v29  ;;  %v484_v40 = vrot.slane %v470_v35, %v1563_v29 }
 0x1c8   : > { %v622_v41 = vpop.permute.xlu1 %621  ;;  %v619_v42 = vpop.permute.xlu0 %618 }
 0x1c9   : > { %v501_v43 = vcombine.low %v477_v39, %v493_v37  ;;  %v502_v44 = vcombine.high %v477_v39, %v493_v37  ;;  %v517_v45 = vcombine.low %v484_v40, %v500_v38  ;;  %v518_v46 = vcombine.high %v484_v40, %v500_v38 }
 0x1ca   : > { %v640_v47 = vcombine.low %v616_v32, %v622_v41  ;;  %v641_v48 = vcombine.high %v616_v32, %v622_v41  ;;  %v624_v49 = vcombine.low %v454_v15, %v619_v42  ;;  %v625_v50 = vcombine.high %v454_v15, %v619_v42 }
 0x1cb   : > { %v509_v51 = vrot.slane %v501_v43, %v1565_v36  ;;  %v516_v52 = vrot.slane %v502_v44, %v1565_v36  ;;  %v525_v53 = vrot.slane %v517_v45, %v1565_v36  ;;  %v532_v54 = vrot.slane %v518_v46, %v1565_v36 }
 0x1cc   : > { %v648_v55 = vrot.slane %v640_v47, %v1563_v29  ;;  %v655_v56 = vrot.slane %v641_v48, %v1563_v29  ;;  %v632_v57 = vrot.slane %v624_v49, %v1563_v29  ;;  %v639_v58 = vrot.slane %v625_v50, %v1563_v29 }
 0x1cd   : > { %v537_v59 = vcombine.low %v509_v51, %v516_v52  ;;  %v964_v60 = vcombine.high %v509_v51, %v516_v52  ;;  %v553_v61 = vcombine.low %v525_v53, %v532_v54  ;;  %v965_v62 = vcombine.high %v525_v53, %v532_v54 }
 0x1ce   : > { %v656_v63 = vcombine.low %v632_v57, %v648_v55  ;;  %v657_v0 = vcombine.high %v632_v57, %v648_v55  ;;  %v672_v1 = vcombine.low %v639_v58, %v655_v56  ;;  %v673_v2 = vcombine.high %v639_v58, %v655_v56 }
 0x1cf   : > { %v544_v3 = vrot.slane %v537_v59, %v1563_v29  ;;  %v552_v4 = vrot.slane %v964_v60, %v1563_v29  ;;  %v560_v5 = vrot.slane %v553_v61, %v1563_v29  ;;  %v568_v6 = vrot.slane %v965_v62, %v1563_v29 }
 0x1d0   : > { %v664_v7 = vrot.slane %v656_v63, %v1565_v36  ;;  %v671_v8 = vrot.slane %v657_v0, %v1565_v36  ;;  %v680_v9 = vrot.slane %v672_v1, %v1565_v36  ;;  %v687_v10 = vrot.slane %v673_v2, %v1565_v36 }
 0x1d1   : > { %v569_v11 = vcombine.low %v544_v3, %v552_v4  ;;  %v570_v12 = vcombine.high %v544_v3, %v552_v4  ;;  %v585_v13 = vcombine.low %v560_v5, %v568_v6  ;;  %v586_v14 = vcombine.high %v560_v5, %v568_v6 }
 0x1d2   : > { %v692_v15 = vcombine.low %v664_v7, %v671_v8  ;;  %v966_v16 = vcombine.high %v664_v7, %v671_v8  ;;  %v708_v17 = vcombine.low %v680_v9, %v687_v10  ;;  %v967_v18 = vcombine.high %v680_v9, %v687_v10 }
 0x1d3   : > { %v577_v19 = vrot.slane %v569_v11, %v1565_v36  ;;  %v584_v20 = vrot.slane %v570_v12, %v1565_v36  ;;  %v593_v21 = vrot.slane %v585_v13, %v1565_v36  ;;  %v600_v22 = vrot.slane %v586_v14, %v1565_v36 }
 0x1d4   : > { %v699_v23 = vrot.slane %v692_v15, %v1563_v29  ;;  %v707_v24 = vrot.slane %v966_v16, %v1563_v29  ;;  %v715_v25 = vrot.slane %v708_v17, %v1563_v29  ;;  %v723_v26 = vrot.slane %v967_v18, %v1563_v29 }
 0x1d5   : > { %v601_v27 = vcombine.low %v577_v19, %v593_v21  ;;  %v602_v28 = vcombine.high %v577_v19, %v593_v21  ;;  %v603_v30 = vcombine.low %v584_v20, %v600_v22  ;;  %v604_v31 = vcombine.high %v584_v20, %v600_v22 }
 0x1d6   : > { %v724_v32 = vcombine.low %v699_v23, %v707_v24  ;;  %v725_v33 = vcombine.high %v699_v23, %v707_v24  ;;  %v740_v34 = vcombine.low %v715_v25, %v723_v26  ;;  %v741_v35 = vcombine.high %v715_v25, %v723_v26 }
 0x1d7   : > { %v605_v37 = vpack.c.bf16 %v601_v27, %v601_v27  ;;  %v606_v38 = vpack.c.bf16 %v602_v28, %v602_v28  ;;  %v607_v29 = vpack.c.bf16 %v603_v30, %v603_v30  ;;  %v608_v39 = vpack.c.bf16 %v604_v31, %v604_v31 }
 0x1d8   : > { %v732_v40 = vrot.slane %v724_v32, %v1565_v36  ;;  %v739_v41 = vrot.slane %v725_v33, %v1565_v36  ;;  %v748_v42 = vrot.slane %v740_v34, %v1565_v36  ;;  %v755_v43 = vrot.slane %v741_v35, %v1565_v36 }
 0x1d9   : > { %610 = vst.msk [vmem:[%s318_s18] sm:$0xf] %vm609_vm2, %v605_v37  ;;  %611 = vst.msk [vmem:[%s318_s18 + $0x4] sm:$0xf] %vm609_vm2, %v606_v38 }
 0x1da   : > { %612 = vst.msk [vmem:[%s318_s18 + $0x8] sm:$0xf] %vm609_vm2, %v607_v29  ;;  %613 = vst.msk [vmem:[%s318_s18 + $0xc] sm:$0xf] %vm609_vm2, %v608_v39  ;;  %v756_v44 = vcombine.low %v732_v40, %v748_v42  ;;  %v757_v45 = vcombine.high %v732_v40, %v748_v42  ;;  %v758_v46 = vcombine.low %v739_v41, %v755_v43 }
 0x1db   : > { %v759_v47 = vcombine.high %v739_v41, %v755_v43 }
 0x1dc   : > { %1202 = shalt.err (!%p1199_p11)
}
 0x1dd   : > { %s1203_s19 = scalar_lea.hbm %s1604_s27, 256  ;;  %s1207_s20 = scalar_lea.hbm %s1722_s5, 512 }
 0x1de   : > { %p1204_p0 = scmp.ne.s32.totalorder %s1604_s27, %s1203_s19  ;;  %p1208_p6 = scmp.lt.u32.totalorder %s1604_s27, %s1722_s5 }
 0x1df   : > { %p1209_p7 = scmp.lt.u32.totalorder %s1207_s20, %s1203_s19  ;;  %p1211_p8 = scmp.lt.u32.totalorder %s1203_s19, %s1604_s27 }
 0x1e0   : > { %p1205_p4 = pnand %p1204_p0, %p1740_p2 }
 0x1e1   : > { %p1210_p12 = por %p1209_p7, %p1208_p6 }
 0x1e2   : > { %p1206_p13 = pneg %p1205_p4 }
 0x1e3   : > { %p1212_p1 = por %p1211_p8, %p1210_p12 }
 0x1e5   : > { %p1213_p10 = pnand %p1212_p1, %p1206_p13 }
 0x1e7   : > { %1216 = shalt.err (!%p1213_p10)
}
 0x1e8   : > { %s1322_s28 = smov 64   ;;  %s1323_s15 = smov 4   ;;  %v760_v36 = vpack.c.bf16 %v756_v44, %v756_v44  ;;  %v761_v48 = vpack.c.bf16 %v757_v45, %v757_v45  ;;  %v762_v49 = vpack.c.bf16 %v758_v46, %v758_v46  ;;  %v763_v50 = vpack.c.bf16 %v759_v47, %v759_v47 }
 0x1e9   : > { %1010 = dma.vmem_to_hbm [thread:$0]  (%p1740_p2), %s1606_s14, 256, %s1604_s27, %s769_s9, %s1322_s28, %s1322_s28, %s1323_s15  }
 0x1ea   : > { %s1653_s10 = scalar_lea.hbm %s1723_s6, %s976_s30  ;;  %764 = vst.msk [vmem:[%s1618_s29] sm:$0xf] %vm609_vm2, %v760_v36  ;;  %765 = vst.msk [vmem:[%s1618_s29 + $0x4] sm:$0xf] %vm609_vm2, %v761_v48  ;;  %s774_s24 = scalar_lea.sflag [#allocation10], %s1545_s17 }
 0x1eb   : > { %766 = vst.msk [vmem:[%s1618_s29 + $0x8] sm:$0xf] %vm609_vm2, %v762_v49  ;;  %767 = vst.msk [vmem:[%s1618_s29 + $0xc] sm:$0xf] %vm609_vm2, %v763_v50  ;;  %s1217_s14 = scalar_lea.vmem %s1657_s7, 256  ;;  %s1324_s30 = smov [#allocation9]  }
 0x1ec   : > { %p1218_p3 = scmp.ne.s32.totalorder %s1657_s7, %s1217_s14  ;;  %s1221_s27 = sshll.u32 %s1324_s30, 4  ;;  %s1222_s27 = int_to_ptr.vmem [resolvable:$false] %s1221_s27 }
 0x1ed   : > { %s1223_s9 = scalar_lea.vmem %s1222_s27, 512  ;;  %p1224_p11 = scmp.lt.s32.totalorder %s1657_s7, %s1222_s27 }
 0x1ee   : > { %p1219_p5 = pnand %p1218_p3, %p1740_p2  ;;  %p1225_p0 = scmp.lt.s32.totalorder %s1223_s9, %s1217_s14 }
 0x1f0   : > { %p1220_p9 = pneg %p1219_p5  ;;  %p1226_p4 = por %p1225_p0, %p1224_p11 }
 0x1f2   : > { %p1227_p13 = pnand %p1226_p4, %p1220_p9 }
 0x1f4   : > { %1230 = shalt.err (!%p1227_p13)
}
 0x1f5   : > { %s1231_s29 = scalar_lea.hbm %s1653_s10, 256  ;;  %s1235_s8 = scalar_lea.hbm %s1723_s6, 512 }
 0x1f6   : > { %p1232_p6 = scmp.ne.s32.totalorder %s1653_s10, %s1231_s29  ;;  %p1236_p8 = scmp.lt.u32.totalorder %s1653_s10, %s1723_s6 }
 0x1f7   : > { %p1237_p1 = scmp.lt.u32.totalorder %s1235_s8, %s1231_s29  ;;  %p1239_p3 = scmp.lt.u32.totalorder %s1231_s29, %s1653_s10 }
 0x1f8   : > { %p1233_p7 = pnand %p1232_p6, %p1740_p2 }
 0x1f9   : > { %p1238_p10 = por %p1237_p1, %p1236_p8 }
 0x1fa   : > { %p1234_p12 = pneg %p1233_p7 }
 0x1fb   : > { %p1240_p5 = por %p1239_p3, %p1238_p10 }
 0x1fd   : > { %p1241_p9 = pnand %p1240_p5, %p1234_p12 }
 0x1ff   : > { %1244 = shalt.err (!%p1241_p9)
}
 0x200   : > { %1011 = dma.vmem_to_hbm [thread:$0]  (%p1740_p2), %s1657_s7, 256, %s1653_s10, %s774_s24, %s1322_s28, %s1322_s28, %s1323_s15  }
 0x201 PF: > { %s1741_s14 = sld [smem:[#allocation15_spill]]  ;;  %s820_s30 = sand.u32 1, %s1287_s21  }
 0x202   : > { %p1743_p0 = scmp.ge.s32.totalorder %s1307_s26, 2  ;;  %s821_s27 = scalar_lea.sflag [#allocation4], %s820_s30 }
 0x207   : > { %p1742_p11 = scmp.ne.s32.totalorder %s1741_s14, 0 }
 0x209   : > { %p1026_p4 = pnand %p1743_p0, %p1742_p11 }
 0x20b   : > { %1278 = dma.done.wait (!%p1026_p4), %s821_s27, 256  }
 0x20c   : > { %1280 = vsyncadd (!%p1026_p4), %s821_s27, 4294967040  ;;  %s830_s12 = scalar_lea.sflag [#allocation10], %s820_s30 }
 0x20d   : > { %1282 = dma.done.wait (!%p1026_p4), %s830_s12, 256  }
 0x20e   : > { %1284 = vsyncadd (!%p1026_p4), %s830_s12, 4294967040  ;;  %s27_s26 = sadd.s32 1, %s1307_s26   ;;  %s1744_s21 = smov %s1291_s22 }
 0x20f   : > { %p24_p13 = scmp.ge.s32.totalorder %s27_s26, 4   ;;  %s1745_s22 = smov %s1295_s23 }
 0x210   : > { %s1746_s23 = smov %s1502_s13  ;;  %s1747_s24 = smov %s1303_s25 }
 0x211   : > { %s1748_s25 = smov %s1750_s16  ;;  %26 = sbr.rel (!%p24_p13) target bundleno = 9 (0x9), region = 110 }
 0x218   :  { %835 = vsyncpa [#allocation3], 1 }
 0x219   :  { %837 = vsyncpa [#allocation3 + $0x1], 1 }
 0x21a   :  { %838 = vsyncpa [#allocation6], 1 }
 0x21b   :  { %839 = vsyncpa [#allocation4], 1 }
 0x21c   :  { %841 = vsyncpa [#allocation4 + $0x1], 1 }
 0x21d   :  { %842 = vsyncpa [#allocation10], 1 }
 0x21e   :  { %844 = vsyncpa [#allocation10 + $0x1], 1 }

</bundles_post_ra>
